<compile_context>
chip_gen: v5e
topology: v5e:2x2
jax: 0.10.0
libtpu: 0.0.40
codegen_flags: <defaults>
</compile_context>

<pallas_src>
import jax
import jax.numpy as jnp
from jax.experimental import pallas as pl
from jax.experimental.pallas import tpu as pltpu


def token_learner_kernel(idx_ref, expr_ref, tableT_ref, wb_ref, out_ref, acc_ref):
    j = pl.program_id(1)                     # vocab (reduction) axis

    @pl.when(j == 0)
    def _init():
        acc_ref[...] = jnp.zeros_like(acc_ref)

    idx = idx_ref[...]                       # (T, tile_n) int32
    table_t = tableT_ref[...]                # (D, tile_v) bf16 (or f32)
    T, tile_n = idx.shape
    tile_v = table_t.shape[1]

    # global vocab ids covered by this vocab block, laid out along sublanes
    base = j * tile_v
    vocab_ids = base + jax.lax.broadcasted_iota(jnp.int32, (tile_v, tile_n), 0)

    # one-hot counts summed over the T token positions (T tiny & static)
    counts = jnp.zeros((tile_v, tile_n), jnp.float32)
    for t in range(T):
        counts = counts + (idx[t:t + 1, :] == vocab_ids).astype(jnp.float32)

    # counts are exact small integers (1/T scale is deferred) -> lossless bf16
    acc_ref[...] += jnp.dot(table_t, counts.astype(table_t.dtype),
                            preferred_element_type=jnp.float32)

    @pl.when(j == pl.num_programs(1) - 1)
    def _finalize():
        wb = wb_ref[...]                     # (D, 2): [:, 0] = weight, [:, 1] = bias
        expr = expr_ref[...]                 # (1, tile_n) f32
        expr_emb = wb[:, 0:1] * expr + wb[:, 1:2]          # (D, tile_n)
        inv_t = 1.0 / T                                    # deferred mean scale
        out_ref[...] = (acc_ref[...] * inv_t + expr_emb).astype(out_ref.dtype)


def _round_up(x, m):
    return ((x + m - 1) // m) * m


def token_learner_forward(seq_indices, expr_values, embed_table, w_expr, b_expr,
                          *, tile_n=256, tile_v=512, mxu_dtype=jnp.bfloat16):
    N, T = seq_indices.shape
    V1, D = embed_table.shape                # V1 = nb_unique_genes + 1

    # --- tile sizing: both tiles are multiples of 128 (lane-dense) ----------
    tile_n = min(tile_n, _round_up(N, 128))
    tile_v = min(tile_v, _round_up(V1, 128))
    assert tile_n % 128 == 0 and tile_v % 128 == 0
    n_pad = _round_up(N, tile_n)
    v_pad = _round_up(V1, tile_v)

    # --- wrapper-side layout plumbing (pad + transpose, done once in XLA) ---
    idx_t = jnp.pad(seq_indices.astype(jnp.int32),
                    ((0, n_pad - N), (0, 0))).T                         # (T, n_pad)
    expr_t = jnp.pad(expr_values.astype(jnp.float32),
                     ((0, n_pad - N), (0, 0))).T                        # (1, n_pad)
    table_t = jnp.pad(embed_table.astype(jnp.float32),
                      ((0, v_pad - V1), (0, 0))).T.astype(mxu_dtype)    # (D, v_pad)
    wb = jnp.concatenate([jnp.reshape(w_expr, (D, 1)),
                          jnp.reshape(b_expr, (D, 1))],
                         axis=1).astype(jnp.float32)                    # (D, 2)

    grid = (n_pad // tile_n, v_pad // tile_v)

    out_t = pl.pallas_call(
        token_learner_kernel,
        out_shape=jax.ShapeDtypeStruct((D, n_pad), jnp.float32),
        grid_spec=pltpu.PrefetchScalarGridSpec(
            num_scalar_prefetch=0,
            grid=grid,
            in_specs=[
                pl.BlockSpec((T, tile_n), lambda i, j: (0, i)),   # seq indices^T
                pl.BlockSpec((1, tile_n), lambda i, j: (0, i)),   # expr values^T
                pl.BlockSpec((D, tile_v), lambda i, j: (0, j)),   # embedding table^T
                pl.BlockSpec((D, 2), lambda i, j: (0, 0)),        # [weight | bias]
            ],
            out_specs=pl.BlockSpec((D, tile_n), lambda i, j: (0, i)),
            scratch_shapes=[pltpu.VMEM((D, tile_n), jnp.float32)],   # f32 accumulator
        ),
        compiler_params=pltpu.CompilerParams(
            dimension_semantics=("parallel", "arbitrary"),
            vmem_limit_bytes=32 * 1024 * 1024,   # explicit budget; footprint is ~MBs
        ),
    )(idx_t, expr_t, table_t, wb)

    return out_t.T[:N, :]                                             # (N, D)


def token_learner_reference(seq_indices, expr_values, embed_table, w_expr, b_expr):
    seq_emb = jnp.take(embed_table, seq_indices, axis=0).mean(axis=1)
    expr_emb = expr_values @ jnp.reshape(w_expr, (-1, 1)).T + jnp.reshape(b_expr, (1, -1))
    return seq_emb + expr_emb


if __name__ == "__main__":
    # small shapes: batch=4 x nb_genes=128 -> N=512 rows; 4 tokens/gene;
    # nb_unique_genes=100 (vocab 101 incl. pad id); embed_dim=32.
    B, G, T, V, D = 4, 128, 4, 100, 32
    N = B * G

    key = jax.random.PRNGKey(0)
    k_tab, k_w, k_b, k_idx, k_expr = jax.random.split(key, 5)

    # deterministic synthetic parameters (shapes from module __init__)
    embed_table = jax.random.normal(k_tab, (V + 1, D), dtype=jnp.float32) * 0.02
    w_expr = jax.random.normal(k_w, (D, 1), dtype=jnp.float32) * 0.1   # Linear(1, D).weight
    b_expr = jax.random.normal(k_b, (D,), dtype=jnp.float32) * 0.1     # Linear(1, D).bias

    # deterministic inputs
    seq_indices = jax.random.randint(k_idx, (N, T), 0, V + 1, dtype=jnp.int32)
    expr_values = jax.random.normal(k_expr, (N, 1), dtype=jnp.float32)

    out = token_learner_forward(seq_indices, expr_values, embed_table, w_expr, b_expr)
    out = jax.block_until_ready(out)

    ref = token_learner_reference(seq_indices, expr_values, embed_table, w_expr, b_expr)
    assert out.shape == (N, D)
    # embedding table is fed to the MXU in bf16 (counts stay exact) -> small tolerance loosening
    assert jnp.allclose(out, ref, atol=2e-3, rtol=1e-2), "mismatch vs reference"

    print("KERNEL_OK")
</pallas_src>

<mosaic_0001>
module attributes {stable_mosaic.version = 11 : i64} {
  func.func @token_learner_kernel(%arg0: i32, %arg1: i32, %arg2: memref<4x256xi32, #tpu.memory_space<vmem>>, %arg3: memref<1x256xf32, #tpu.memory_space<vmem>>, %arg4: memref<32x128xbf16, #tpu.memory_space<vmem>>, %arg5: memref<32x2xf32, #tpu.memory_space<vmem>>, %arg6: memref<32x256xf32, #tpu.memory_space<vmem>>, %arg7: memref<32x256xf32, #tpu.memory_space<vmem>>) attributes {dimension_semantics = [#tpu.dimension_semantics<parallel>, #tpu.dimension_semantics<arbitrary>], iteration_bounds = array<i64: 2, 1>, scalar_prefetch = 0 : i64, scratch_operands = 1 : i64, tpu.core_type = #tpu.core_type<tc>, window_params = [{transform_indices = @transform_0, window_bounds = array<i64: 4, 256>}, {transform_indices = @transform_1, window_bounds = array<i64: 1, 256>}, {transform_indices = @transform_2, window_bounds = array<i64: 32, 128>}, {pipeline_mode = #tpu.pipeline_mode<synchronous>, transform_indices = @transform_3, window_bounds = array<i64: 32, 2>}, {transform_indices = @transform_4, window_bounds = array<i64: 32, 256>}]} {
    %c0_i32 = arith.constant 0 : i32
    %0 = arith.cmpi eq, %arg1, %c0_i32 : i32
    %1 = arith.extui %0 : i1 to i32
    %c0_i32_0 = arith.constant 0 : i32
    %2 = arith.cmpi ne, %1, %c0_i32_0 : i32
    scf.if %2 {
      %cst_11 = arith.constant 0.000000e+00 : f32
      %42 = vector.broadcast %cst_11 : f32 to vector<32x256xf32>
      %c0_12 = arith.constant 0 : index
      %c0_13 = arith.constant 0 : index
      %43 = vector.load %arg7[%c0_12, %c0_13] : memref<32x256xf32, #tpu.memory_space<vmem>>, vector<32x256xf32>
      tpu.vector_store %arg7[%c0_12, %c0_13], %42 {strides = array<i32>} : memref<32x256xf32, #tpu.memory_space<vmem>>, vector<32x256xf32>,
    } else {
    }
    %c0 = arith.constant 0 : index
    %c0_1 = arith.constant 0 : index
    %3 = vector.load %arg2[%c0, %c0_1] : memref<4x256xi32, #tpu.memory_space<vmem>>, vector<4x256xi32>
    %c0_2 = arith.constant 0 : index
    %c0_3 = arith.constant 0 : index
    %4 = vector.load %arg4[%c0_2, %c0_3] : memref<32x128xbf16, #tpu.memory_space<vmem>>, vector<32x128xbf16>
    %c128_i32 = arith.constant 128 : i32
    %5 = arith.muli %arg1, %c128_i32 : i32
    %6 = tpu.iota {dimensions = array<i32: 0>} : vector<128x256xi32>
    %7 = vector.broadcast %5 : i32 to vector<128x256xi32>
    %8 = arith.addi %7, %6 : vector<128x256xi32>
    %cst = arith.constant 0.000000e+00 : f32
    %9 = vector.broadcast %cst : f32 to vector<128x256xf32>
    %10 = vector.extract_strided_slice %3 {offsets = [0, 0], sizes = [1, 256], strides = [1, 1]} : vector<4x256xi32> to vector<1x256xi32>
    %11 = vector.broadcast %10 : vector<1x256xi32> to vector<128x256xi32>
    %12 = arith.cmpi eq, %11, %8 : vector<128x256xi32>
    %13 = arith.extui %12 : vector<128x256xi1> to vector<128x256xi32>
    %14 = arith.sitofp %13 : vector<128x256xi32> to vector<128x256xf32>
    %15 = arith.addf %9, %14 : vector<128x256xf32>
    %16 = vector.extract_strided_slice %3 {offsets = [1, 0], sizes = [1, 256], strides = [1, 1]} : vector<4x256xi32> to vector<1x256xi32>
    %17 = vector.broadcast %16 : vector<1x256xi32> to vector<128x256xi32>
    %18 = arith.cmpi eq, %17, %8 : vector<128x256xi32>
    %19 = arith.extui %18 : vector<128x256xi1> to vector<128x256xi32>
    %20 = arith.sitofp %19 : vector<128x256xi32> to vector<128x256xf32>
    %21 = arith.addf %15, %20 : vector<128x256xf32>
    %22 = vector.extract_strided_slice %3 {offsets = [2, 0], sizes = [1, 256], strides = [1, 1]} : vector<4x256xi32> to vector<1x256xi32>
    %23 = vector.broadcast %22 : vector<1x256xi32> to vector<128x256xi32>
    %24 = arith.cmpi eq, %23, %8 : vector<128x256xi32>
    %25 = arith.extui %24 : vector<128x256xi1> to vector<128x256xi32>
    %26 = arith.sitofp %25 : vector<128x256xi32> to vector<128x256xf32>
    %27 = arith.addf %21, %26 : vector<128x256xf32>
    %28 = vector.extract_strided_slice %3 {offsets = [3, 0], sizes = [1, 256], strides = [1, 1]} : vector<4x256xi32> to vector<1x256xi32>
    %29 = vector.broadcast %28 : vector<1x256xi32> to vector<128x256xi32>
    %30 = arith.cmpi eq, %29, %8 : vector<128x256xi32>
    %31 = arith.extui %30 : vector<128x256xi1> to vector<128x256xi32>
    %32 = arith.sitofp %31 : vector<128x256xi32> to vector<128x256xf32>
    %33 = arith.addf %27, %32 : vector<128x256xf32>
    %c0_4 = arith.constant 0 : index
    %c0_5 = arith.constant 0 : index
    %34 = vector.load %arg7[%c0_4, %c0_5] : memref<32x256xf32, #tpu.memory_space<vmem>>, vector<32x256xf32>
    %35 = arith.truncf %33 : vector<128x256xf32> to vector<128x256xbf16>
    %cst_6 = arith.constant dense<0.000000e+00> : vector<32x256xf32>
    %36 = tpu.matmul %4, %35, %cst_6 {dimension_numbers = #tpu.dot_dimension_numbers<[1], [0], [0], [1], [0, 0, 1, 1], [], []>} : vector<32x128xbf16>, vector<128x256xbf16>, vector<32x256xf32> -> vector<32x256xf32>
    %37 = arith.addf %34, %36 : vector<32x256xf32>
    %c0_7 = arith.constant 0 : index
    %c0_8 = arith.constant 0 : index
    %38 = vector.load %arg7[%c0_7, %c0_8] : memref<32x256xf32, #tpu.memory_space<vmem>>, vector<32x256xf32>
    tpu.vector_store %arg7[%c0_7, %c0_8], %37 {strides = array<i32>} : memref<32x256xf32, #tpu.memory_space<vmem>>, vector<32x256xf32>,
    %c0_i32_9 = arith.constant 0 : i32
    %39 = arith.cmpi eq, %arg1, %c0_i32_9 : i32
    %40 = arith.extui %39 : i1 to i32
    %c0_i32_10 = arith.constant 0 : i32
    %41 = arith.cmpi ne, %40, %c0_i32_10 : i32
    scf.if %41 {
      %c0_11 = arith.constant 0 : index
      %c0_12 = arith.constant 0 : index
      %42 = vector.load %arg5[%c0_11, %c0_12] : memref<32x2xf32, #tpu.memory_space<vmem>>, vector<32x2xf32>
      %c0_13 = arith.constant 0 : index
      %c0_14 = arith.constant 0 : index
      %43 = vector.load %arg3[%c0_13, %c0_14] : memref<1x256xf32, #tpu.memory_space<vmem>>, vector<1x256xf32>
      %44 = vector.extract_strided_slice %42 {offsets = [0, 0], sizes = [32, 1], strides = [1, 1]} : vector<32x2xf32> to vector<32x1xf32>
      %45 = vector.broadcast %44 : vector<32x1xf32> to vector<32x256xf32>
      %46 = vector.broadcast %43 : vector<1x256xf32> to vector<32x256xf32>
      %47 = arith.mulf %45, %46 : vector<32x256xf32>
      %48 = vector.extract_strided_slice %42 {offsets = [0, 1], sizes = [32, 1], strides = [1, 1]} : vector<32x2xf32> to vector<32x1xf32>
      %49 = vector.broadcast %48 : vector<32x1xf32> to vector<32x256xf32>
      %50 = arith.addf %47, %49 : vector<32x256xf32>
      %c0_15 = arith.constant 0 : index
      %c0_16 = arith.constant 0 : index
      %51 = vector.load %arg7[%c0_15, %c0_16] : memref<32x256xf32, #tpu.memory_space<vmem>>, vector<32x256xf32>
      %cst_17 = arith.constant 2.500000e-01 : f32
      %52 = vector.broadcast %cst_17 : f32 to vector<32x256xf32>
      %53 = arith.mulf %51, %52 : vector<32x256xf32>
      %54 = arith.addf %53, %50 : vector<32x256xf32>
      %c0_18 = arith.constant 0 : index
      %c0_19 = arith.constant 0 : index
      %55 = vector.load %arg6[%c0_18, %c0_19] : memref<32x256xf32, #tpu.memory_space<vmem>>, vector<32x256xf32>
      tpu.vector_store %arg6[%c0_18, %c0_19], %54 {strides = array<i32>} : memref<32x256xf32, #tpu.memory_space<vmem>>, vector<32x256xf32>,
    } else {
    }
    return
  }
  func.func @transform_0(%arg0: i32, %arg1: i32) -> (i32, i32) {
    %c0_i32 = arith.constant 0 : i32
    %c0_i32_0 = arith.constant 0 : i32
    return %c0_i32, %arg0 : i32, i32
  }
  func.func @transform_1(%arg0: i32, %arg1: i32) -> (i32, i32) {
    %c0_i32 = arith.constant 0 : i32
    %c0_i32_0 = arith.constant 0 : i32
    return %c0_i32, %arg0 : i32, i32
  }
  func.func @transform_2(%arg0: i32, %arg1: i32) -> (i32, i32) {
    %c0_i32 = arith.constant 0 : i32
    %c0_i32_0 = arith.constant 0 : i32
    return %c0_i32, %arg1 : i32, i32
  }
  func.func @transform_3(%arg0: i32, %arg1: i32) -> (i32, i32) {
    %c0_i32 = arith.constant 0 : i32
    %c0_i32_0 = arith.constant 0 : i32
    %c0_i32_1 = arith.constant 0 : i32
    return %c0_i32, %c0_i32_0 : i32, i32
  }
  func.func @transform_4(%arg0: i32, %arg1: i32) -> (i32, i32) {
    %c0_i32 = arith.constant 0 : i32
    %c0_i32_0 = arith.constant 0 : i32
    return %c0_i32, %arg0 : i32, i32
  }
}

</mosaic_0001>

<bundles_post_ra>
// kernel: tpu_custom_call.1
= control target key start
LH: loop header
LB: loop body
LE: loop exit
PB: predicated region body
PF: predicated region fallthrough
CT: control target
= control target key end

     0   :  { %9 = vsyncpa [#allocation4], 0  ;;  %s2122_s0 = inlined_call_operand.vmem [shape: s32[4,512], index: 0, kind: input, shape index: {}]   ;;  %s2123_s1 = inlined_call_operand.hbm [shape: f32[1,512], index: 1, kind: input, shape index: {}]   ;;  %s2124_s2 = inlined_call_operand.vmem [shape: bf16[32,128], index: 2, kind: input, shape index: {}]   ;;  %s2125_s3 = inlined_call_operand.vmem [shape: f32[32,2], index: 3, kind: input, shape index: {}]   ;;  %s2126_s4 = inlined_call_operand.hbm [shape: f32[32,512], index: 4, kind: output, shape index: {}]  }
   0x1   :  { %11 = vsyncpa [#allocation4 + $0x1], 0 }
   0x2   :  { %12 = vsyncpa [#allocation5], 0 }
   0x3   :  { %14 = vsyncpa [#allocation5 + $0x1], 0  ;;  %s1549_s15 = smov 0   ;;  %s1551_s16 = smov 0  }
   0x4   :  { %s1553_s17 = smov 0   ;;  %s1555_s18 = smov 0  }
   0x5   :  { %s1557_s19 = smov 0   ;;  %s1559_s20 = smov 0  }
   0x6 LB: > { %s1159_s21 = sadd.s32 4294967295, %s1516_s20   ;;  %s1160_s22 = sadd.s32 4294967294, %s1516_s20   ;;  %s1516_s20 = sphi %s1559_s20, %s20_s20   ;;  %s1512_s19 = sphi %s1557_s19, %s2135_s19   ;;  %s1508_s18 = sphi %s1555_s18, %s2134_s18   ;;  %s1504_s17 = sphi %s1553_s17, %s2133_s17   ;;  %s1500_s16 = sphi %s1551_s16, %s2132_s16   ;;  %s1496_s15 = sphi %s1549_s15, %s2131_s15  }
   0x7   : > { %s32_s23 = sadd.s32 1, %s1512_s19  ;;  %s65_s24 = sadd.s32 1, %s1504_s17 }
   0x8   : > { %p34_p0 = scmp.ge.s32.totalorder %s32_s23, 2  ;;  %p72_p1 = scmp.ne.s32.totalorder %s1504_s17, %s1500_s16 }
   0x9   : > { %p73_p2 = scmp.eq.s32.totalorder %s1516_s20, 0  ;;  %p78_p3 = scmp.ne.s32.totalorder %s1500_s16, %s1496_s15 }
   0xa   : > { %s2137_s23 = smov (%p34_p0, %s32_s23), 0  ;;  %p79_p5 = scmp.eq.s32.totalorder %s1159_s21, 0 }
   0xb   : > { %p1590_p4 = por %p73_p2, %p72_p1  ;;  %s62_s26 = ssub.s32 %s1512_s19, %s2137_s23 }
   0xc   : > { %p149_p6 = scmp.eq.s32.totalorder %s1159_s21, 1  ;;  %p63_p7 = scmp.eq.s32.totalorder %s62_s26, 0 }
   0xd   : > { %p1596_p8 = por %p79_p5, %p78_p3  ;;  %p155_p10 = scmp.eq.s32.totalorder %s1160_s22, 1 }
   0xe   : > { %p1600_p9 = por %p149_p6, %p72_p1  ;;  %p1163_p12 = scmp.ge.s32.totalorder %s1516_s20, 2 }
   0xf   : > { %s1605_s29 = scalar_select %p63_p7, %s1504_s17, %s65_s24  }
  0x10   : > { %p1607_p11 = por %p155_p10, %p78_p3  ;;  %p1343_p13 = scmp.lt.s32.totalorder %s1516_s20, 2 }
  0x11   : > { %s194_s5 = sand.u32 1, %s1504_s17   ;;  %s1165_s7 = sshll.u32 %s1512_s19, 1 }
  0x12   : > { %s1164_s6 = sshll.u32 %s194_s5, 1  ;;  %s202_s10 = scalar_lea.hbm %s2123_s1, %s1165_s7 }
  0x13   : > { %s198_s11 = scalar_lea.vmem [#allocation3], %s1164_s6  ;;  %s204_s13 = sshll.u32 %s202_s10, 4  ;;  %s205_s13 = int_to_ptr.hbm [resolvable:$true] %s204_s13 }
  0x14   : > { %s206_s12 = sshll.u32 %s198_s11, 4  ;;  %p1336_p0 = pnand %p1343_p13, %p1590_p4  ;;  %s207_s12 = int_to_ptr.vmem [resolvable:$true] %s206_s12 }
  0x15   : > { %p1166_p1 = scmp.ge.s32.totalorder %s1516_s20, 1  ;;  %p211_p2 = scmp.lt.s32.totalorder %s1516_s20, 3 }
  0x16   : > { %s195_s14 = scalar_lea.sflag [#allocation4], %s194_s5 }
  0x17   : > { %1338 = dma.hbm_to_vmem [thread:$0]  (!%p1336_p0), %s205_s13, 32, %s207_s12, %s195_s14  }
  0x18   : > { %p212_p3 = pnand %p1166_p1, %p211_p2 }
  0x19   : > { %s1623_s21 = sand.u32 (!%p212_p3), 1, %s1500_s16  }
  0x1a   : > { %215 = sbr.rel (%p212_p3) target bundleno = 295 (0x127), region = 36  ;;  %s1167_s22 = sshll.u32 (!%p212_p3), %s1623_s21, 1 }
  0x1b   : > { %s218_s24 = scalar_lea.sflag (!%p212_p3), [#allocation4], %s1623_s21  ;;  %s1627_s26 = scalar_lea.vmem (!%p212_p3), [#allocation3], %s1167_s22 }
  0x1f   : > { %1487 = dma.done.wait (%p1596_p8), %s218_s24, 32  }
  0x20   : > { %1489 = vsyncadd (%p1596_p8), %s218_s24, 4294967264  ;;  %s1169_s25 = sshll.u32 %s1508_s18, 1  ;;  %v286_v0 = vlaneseq  ;;  %v1518_v25 = vmov 0.0   ;;  %s1168_s7 = sshll.u32 %s1623_s21, 6 }
  0x21   : > { %p257_p4 = scmp.lt.s32.totalorder %s1169_s25, 3  ;;  %s1036_s12 = scalar_lea.sflag [#allocation5], %s1623_s21 }
  0x22   : > { %v1634_v1 = vshrl.u32 %v286_v0, 7 }
  0x23   : > { %s2139_s25 = smov (!%p257_p4, %s1169_s25), 3 }
  0x24   : > { %s1170_s5 = sshll.u32 %s2139_s25, 2  ;;  %v1640_v2 = vadd.s32 112, %v1634_v1  ;;  %v1643_v3 = vadd.s32 120, %v1634_v1  ;;  %v1646_v5 = vadd.s32 96, %v1634_v1  ;;  %v1649_v6 = vadd.s32 104, %v1634_v1  ;;  %s1454_s25 = scalar_lea.hbm %s2126_s4, 128 }
  0x25   : > { %s260_s8 = scalar_lea.vmem %s2122_s0, %s1170_s5  ;;  %v1652_v7 = vadd.s32 80, %v1634_v1  ;;  %v1655_v8 = vadd.s32 88, %v1634_v1 }
  0x26   : > { %v280_v4 = vld [vmem:[%s260_s8] sm:$0xff]  ;;  %s2073_s8 = scalar_lea.vmem [#allocation6], %s1168_s7 }
  0x27   : > { %v320_v9 = vperm.slane %v280_v4, 0  ;;  %v452_v10 = vperm.slane %v280_v4, 1  ;;  %v584_v11 = vperm.slane %v280_v4, 2  ;;  %v716_v12 = vperm.slane %v280_v4, 3  ;;  %s1048_s11 = sshll.u32 %s2073_s8, 4  ;;  %s1049_s11 = int_to_ptr.vmem [resolvable:$true] %s1048_s11 }
  0x28   : > { %v321_v13 = vperm.slane %v280_v4, 4  ;;  %v453_v14 = vperm.slane %v280_v4, 5  ;;  %v585_v15 = vperm.slane %v280_v4, 6  ;;  %v717_v16 = vperm.slane %v280_v4, 7 }
  0x29   : > { %v1657_v17 = vperm.slane %v320_v9, 0  ;;  %v1659_v18 = vperm.slane %v452_v10, 1  ;;  %v1661_v19 = vperm.slane %v584_v11, 2  ;;  %v1663_v20 = vperm.slane %v716_v12, 3 }
  0x2a   : > { %v1665_v21 = vperm.slane %v321_v13, 0  ;;  %v1667_v22 = vperm.slane %v453_v14, 1  ;;  %v1669_v23 = vperm.slane %v585_v15, 2  ;;  %v1671_v24 = vperm.slane %v717_v16, 3 }
  0x2b   : > { %vm352_vm0 = vcmp.eq.s32.totalorder %v1657_v17, %v1640_v2  ;;  %vm354_vm1 = vcmp.eq.s32.totalorder %v1657_v17, %v1643_v3  ;;  %vm484_vm2 = vcmp.eq.s32.totalorder %v1659_v18, %v1640_v2  ;;  %vm486_vm3 = vcmp.eq.s32.totalorder %v1659_v18, %v1643_v3 }
  0x2c   : > { %v1199_v26 = vsel %vm352_vm0, 1.0, %v1518_v25  ;;  %v1201_v27 = vsel %vm354_vm1, 1.0, %v1518_v25  ;;  %v1231_v28 = vsel %vm484_vm2, 1.0, %v1518_v25  ;;  %v1233_v29 = vsel %vm486_vm3, 1.0, %v1518_v25 }
  0x2d   : > { %v580_v30 = vadd.f32 %v1231_v28, %v1199_v26  ;;  %v582_v31 = vadd.f32 %v1233_v29, %v1201_v27  ;;  %vm616_vm4 = vcmp.eq.s32.totalorder %v1661_v19, %v1640_v2  ;;  %vm618_vm5 = vcmp.eq.s32.totalorder %v1661_v19, %v1643_v3 }
  0x2e   : > { %v1263_v32 = vsel %vm616_vm4, 1.0, %v1518_v25  ;;  %v1265_v33 = vsel %vm618_vm5, 1.0, %v1518_v25  ;;  %vm748_vm6 = vcmp.eq.s32.totalorder %v1663_v20, %v1640_v2  ;;  %vm750_vm7 = vcmp.eq.s32.totalorder %v1663_v20, %v1643_v3 }
  0x2f   : > { %v712_v34 = vadd.f32 %v1263_v32, %v580_v30  ;;  %v714_v35 = vadd.f32 %v1265_v33, %v582_v31  ;;  %v1295_v36 = vsel %vm748_vm6, 1.0, %v1518_v25  ;;  %v1297_v37 = vsel %vm750_vm7, 1.0, %v1518_v25 }
  0x30   : > { %vm353_vm8 = vcmp.eq.s32.totalorder %v1665_v21, %v1640_v2  ;;  %vm355_vm9 = vcmp.eq.s32.totalorder %v1665_v21, %v1643_v3  ;;  %vm485_vm10 = vcmp.eq.s32.totalorder %v1667_v22, %v1640_v2  ;;  %vm487_vm11 = vcmp.eq.s32.totalorder %v1667_v22, %v1643_v3 }
  0x31   : > { %v844_v38 = vadd.f32 %v1295_v36, %v712_v34  ;;  %v846_v39 = vadd.f32 %v1297_v37, %v714_v35  ;;  %v1200_v40 = vsel %vm353_vm8, 1.0, %v1518_v25  ;;  %v1202_v41 = vsel %vm355_vm9, 1.0, %v1518_v25 }
  0x32   : > { %v1232_v42 = vsel %vm485_vm10, 1.0, %v1518_v25  ;;  %v1234_v43 = vsel %vm487_vm11, 1.0, %v1518_v25  ;;  %vm617_vm12 = vcmp.eq.s32.totalorder %v1669_v23, %v1640_v2  ;;  %vm619_vm13 = vcmp.eq.s32.totalorder %v1669_v23, %v1643_v3 }
  0x33   : > { %v870_v44 = vpack.c.bf16 %v846_v39, %v844_v38  ;;  %v581_v45 = vadd.f32 %v1232_v42, %v1200_v40  ;;  %v583_v46 = vadd.f32 %v1234_v43, %v1202_v41  ;;  %v1264_v47 = vsel %vm617_vm12, 1.0, %v1518_v25 }
  0x34   : > { %v1266_v48 = vsel %vm619_vm13, 1.0, %v1518_v25  ;;  %vm749_vm14 = vcmp.eq.s32.totalorder %v1671_v24, %v1640_v2  ;;  %vm751_vm15 = vcmp.eq.s32.totalorder %v1671_v24, %v1643_v3  ;;  %vm348_vm0 = vcmp.eq.s32.totalorder %v1657_v17, %v1646_v5 }
  0x35   : > { %884 = vmatpush.bf16.msra.mxu0 %v870_v44  ;;  %1315 = vmatpush.bf16.msra.mxu2 %v870_v44  ;;  %v713_v49 = vadd.f32 %v1264_v47, %v581_v45  ;;  %v715_v50 = vadd.f32 %v1266_v48, %v583_v46  ;;  %v1296_v51 = vsel %vm749_vm14, 1.0, %v1518_v25  ;;  %v1298_v52 = vsel %vm751_vm15, 1.0, %v1518_v25 }
  0x36   : > { %vm350_vm1 = vcmp.eq.s32.totalorder %v1657_v17, %v1649_v6  ;;  %v1195_v53 = vsel %vm348_vm0, 1.0, %v1518_v25  ;;  %vm480_vm2 = vcmp.eq.s32.totalorder %v1659_v18, %v1646_v5  ;;  %vm482_vm3 = vcmp.eq.s32.totalorder %v1659_v18, %v1649_v6 }
  0x37   : > { %v845_v54 = vadd.f32 %v1296_v51, %v713_v49  ;;  %v847_v55 = vadd.f32 %v1298_v52, %v715_v50  ;;  %v1197_v56 = vsel %vm350_vm1, 1.0, %v1518_v25  ;;  %v1227_v57 = vsel %vm480_vm2, 1.0, %v1518_v25 }
  0x38   : > { %v1229_v58 = vsel %vm482_vm3, 1.0, %v1518_v25  ;;  %v576_v59 = vadd.f32 %v1227_v57, %v1195_v53  ;;  %vm612_vm4 = vcmp.eq.s32.totalorder %v1661_v19, %v1646_v5  ;;  %vm614_vm5 = vcmp.eq.s32.totalorder %v1661_v19, %v1649_v6 }
  0x39   : > { %v871_v60 = vpack.c.bf16 %v847_v55, %v845_v54  ;;  %v578_v61 = vadd.f32 %v1229_v58, %v1197_v56  ;;  %v1259_v62 = vsel %vm612_vm4, 1.0, %v1518_v25  ;;  %v1261_v63 = vsel %vm614_vm5, 1.0, %v1518_v25 }
  0x3a   : > { %v708_v0 = vadd.f32 %v1259_v62, %v576_v59  ;;  %vm744_vm6 = vcmp.eq.s32.totalorder %v1663_v20, %v1646_v5  ;;  %vm746_vm7 = vcmp.eq.s32.totalorder %v1663_v20, %v1649_v6  ;;  %vm349_vm8 = vcmp.eq.s32.totalorder %v1665_v21, %v1646_v5 }
  0x3b   : > { %903 = vmatpush.bf16.msra.mxu1 %v871_v60  ;;  %1323 = vmatpush.bf16.msra.mxu3 %v871_v60  ;;  %v710_v2 = vadd.f32 %v1261_v63, %v578_v61  ;;  %v1291_v3 = vsel %vm744_vm6, 1.0, %v1518_v25  ;;  %v1293_v4 = vsel %vm746_vm7, 1.0, %v1518_v25  ;;  %vm351_vm9 = vcmp.eq.s32.totalorder %v1665_v21, %v1649_v6 }
  0x3c   : > { %v840_v9 = vadd.f32 %v1291_v3, %v708_v0  ;;  %v1196_v10 = vsel %vm349_vm8, 1.0, %v1518_v25  ;;  %v1198_v11 = vsel %vm351_vm9, 1.0, %v1518_v25  ;;  %vm481_vm10 = vcmp.eq.s32.totalorder %v1667_v22, %v1646_v5 }
  0x3d   : > { %v842_v12 = vadd.f32 %v1293_v4, %v710_v2  ;;  %vm483_vm11 = vcmp.eq.s32.totalorder %v1667_v22, %v1649_v6  ;;  %v1228_v13 = vsel %vm481_vm10, 1.0, %v1518_v25  ;;  %vm613_vm12 = vcmp.eq.s32.totalorder %v1669_v23, %v1646_v5 }
  0x3e   : > { %v1230_v14 = vsel %vm483_vm11, 1.0, %v1518_v25  ;;  %v577_v15 = vadd.f32 %v1228_v13, %v1196_v10  ;;  %vm615_vm13 = vcmp.eq.s32.totalorder %v1669_v23, %v1649_v6  ;;  %v1260_v16 = vsel %vm613_vm12, 1.0, %v1518_v25 }
  0x3f   : > { %v868_v26 = vpack.c.bf16 %v842_v12, %v840_v9  ;;  %v579_v27 = vadd.f32 %v1230_v14, %v1198_v11  ;;  %v1262_v28 = vsel %vm615_vm13, 1.0, %v1518_v25  ;;  %vm745_vm14 = vcmp.eq.s32.totalorder %v1671_v24, %v1646_v5 }
  0x40   : > { %v709_v29 = vadd.f32 %v1260_v16, %v577_v15  ;;  %vm747_vm15 = vcmp.eq.s32.totalorder %v1671_v24, %v1649_v6  ;;  %v1292_v30 = vsel %vm745_vm14, 1.0, %v1518_v25  ;;  %vm344_vm0 = vcmp.eq.s32.totalorder %v1657_v17, %v1652_v7 }
  0x41   : > { %885 = vmatpush.bf16.msra.mxu0 %v868_v26  ;;  %1316 = vmatpush.bf16.msra.mxu2 %v868_v26  ;;  %v711_v31 = vadd.f32 %v1262_v28, %v579_v27  ;;  %v1294_v32 = vsel %vm747_vm15, 1.0, %v1518_v25  ;;  %vm346_vm1 = vcmp.eq.s32.totalorder %v1657_v17, %v1655_v8  ;;  %v1191_v33 = vsel %vm344_vm0, 1.0, %v1518_v25 }
  0x42   : > { %v841_v5 = vadd.f32 %v1292_v30, %v709_v29  ;;  %v1193_v34 = vsel %vm346_vm1, 1.0, %v1518_v25  ;;  %vm476_vm2 = vcmp.eq.s32.totalorder %v1659_v18, %v1652_v7  ;;  %vm478_vm3 = vcmp.eq.s32.totalorder %v1659_v18, %v1655_v8 }
  0x43   : > { %v843_v6 = vadd.f32 %v1294_v32, %v711_v31  ;;  %v1223_v35 = vsel %vm476_vm2, 1.0, %v1518_v25  ;;  %v1225_v36 = vsel %vm478_vm3, 1.0, %v1518_v25  ;;  %vm608_vm4 = vcmp.eq.s32.totalorder %v1661_v19, %v1652_v7 }
  0x44   : > { %v572_v37 = vadd.f32 %v1223_v35, %v1191_v33  ;;  %v574_v38 = vadd.f32 %v1225_v36, %v1193_v34  ;;  %vm610_vm5 = vcmp.eq.s32.totalorder %v1661_v19, %v1655_v8  ;;  %v1255_v39 = vsel %vm608_vm4, 1.0, %v1518_v25 }
  0x45   : > { %v869_v40 = vpack.c.bf16 %v843_v6, %v841_v5  ;;  %v1257_v41 = vsel %vm610_vm5, 1.0, %v1518_v25  ;;  %vm740_vm6 = vcmp.eq.s32.totalorder %v1663_v20, %v1652_v7  ;;  %vm742_vm7 = vcmp.eq.s32.totalorder %v1663_v20, %v1655_v8 }
  0x46   : > { %v704_v42 = vadd.f32 %v1255_v39, %v572_v37  ;;  %v706_v43 = vadd.f32 %v1257_v41, %v574_v38  ;;  %v1287_v44 = vsel %vm740_vm6, 1.0, %v1518_v25  ;;  %v1289_v45 = vsel %vm742_vm7, 1.0, %v1518_v25 }
  0x47   : > { %904 = vmatpush.bf16.msra.mxu1 %v869_v40  ;;  %1324 = vmatpush.bf16.msra.mxu3 %v869_v40  ;;  %vm345_vm8 = vcmp.eq.s32.totalorder %v1665_v21, %v1652_v7  ;;  %vm347_vm9 = vcmp.eq.s32.totalorder %v1665_v21, %v1655_v8  ;;  %vm477_vm10 = vcmp.eq.s32.totalorder %v1667_v22, %v1652_v7  ;;  %v1800_v46 = vadd.s32 64, %v1634_v1 }
  0x48   : > { %v836_v47 = vadd.f32 %v1287_v44, %v704_v42  ;;  %v838_v48 = vadd.f32 %v1289_v45, %v706_v43  ;;  %v1192_v49 = vsel %vm345_vm8, 1.0, %v1518_v25  ;;  %v1194_v50 = vsel %vm347_vm9, 1.0, %v1518_v25 }
  0x49   : > { %vm479_vm11 = vcmp.eq.s32.totalorder %v1667_v22, %v1655_v8  ;;  %v1224_v51 = vsel %vm477_vm10, 1.0, %v1518_v25  ;;  %vm609_vm12 = vcmp.eq.s32.totalorder %v1669_v23, %v1652_v7  ;;  %vm611_vm13 = vcmp.eq.s32.totalorder %v1669_v23, %v1655_v8 }
  0x4a   : > { %v866_v52 = vpack.c.bf16 %v838_v48, %v836_v47  ;;  %v1226_v53 = vsel %vm479_vm11, 1.0, %v1518_v25  ;;  %v573_v54 = vadd.f32 %v1224_v51, %v1192_v49  ;;  %v1256_v55 = vsel %vm609_vm12, 1.0, %v1518_v25 }
  0x4b   : > { %v575_v56 = vadd.f32 %v1226_v53, %v1194_v50  ;;  %v1258_v57 = vsel %vm611_vm13, 1.0, %v1518_v25  ;;  %vm741_vm14 = vcmp.eq.s32.totalorder %v1671_v24, %v1652_v7  ;;  %vm743_vm15 = vcmp.eq.s32.totalorder %v1671_v24, %v1655_v8 }
  0x4c   : > { %886 = vmatpush.bf16.msra.mxu0 %v866_v52  ;;  %1317 = vmatpush.bf16.msra.mxu2 %v866_v52  ;;  %v705_v58 = vadd.f32 %v1256_v55, %v573_v54  ;;  %v1288_v59 = vsel %vm741_vm14, 1.0, %v1518_v25  ;;  %v1290_v60 = vsel %vm743_vm15, 1.0, %v1518_v25  ;;  %v296_v61 = vadd.s32 72, %v1634_v1 }
  0x4d   : > { %v707_v62 = vadd.f32 %v1258_v57, %v575_v56  ;;  %vm340_vm0 = vcmp.eq.s32.totalorder %v1657_v17, %v1800_v46  ;;  %vm472_vm1 = vcmp.eq.s32.totalorder %v1659_v18, %v1800_v46  ;;  %vm604_vm2 = vcmp.eq.s32.totalorder %v1661_v19, %v1800_v46 }
  0x4e   : > { %v837_v7 = vadd.f32 %v1288_v59, %v705_v58  ;;  %vm342_vm3 = vcmp.eq.s32.totalorder %v1657_v17, %v296_v61  ;;  %v1187_v8 = vsel %vm340_vm0, 1.0, %v1518_v25  ;;  %vm474_vm4 = vcmp.eq.s32.totalorder %v1659_v18, %v296_v61 }
  0x4f   : > { %v839_v63 = vadd.f32 %v1290_v60, %v707_v62  ;;  %v1189_v0 = vsel %vm342_vm3, 1.0, %v1518_v25  ;;  %v1219_v2 = vsel %vm472_vm1, 1.0, %v1518_v25  ;;  %v1221_v3 = vsel %vm474_vm4, 1.0, %v1518_v25 }
  0x50   : > { %v568_v4 = vadd.f32 %v1219_v2, %v1187_v8  ;;  %v570_v9 = vadd.f32 %v1221_v3, %v1189_v0  ;;  %vm606_vm5 = vcmp.eq.s32.totalorder %v1661_v19, %v296_v61  ;;  %v1251_v10 = vsel %vm604_vm2, 1.0, %v1518_v25 }
  0x51   : > { %v867_v11 = vpack.c.bf16 %v839_v63, %v837_v7  ;;  %v1253_v12 = vsel %vm606_vm5, 1.0, %v1518_v25  ;;  %vm736_vm6 = vcmp.eq.s32.totalorder %v1663_v20, %v1800_v46  ;;  %vm738_vm7 = vcmp.eq.s32.totalorder %v1663_v20, %v296_v61 }
  0x52   : > { %v700_v13 = vadd.f32 %v1251_v10, %v568_v4  ;;  %v702_v14 = vadd.f32 %v1253_v12, %v570_v9  ;;  %v1283_v15 = vsel %vm736_vm6, 1.0, %v1518_v25  ;;  %v1285_v16 = vsel %vm738_vm7, 1.0, %v1518_v25 }
  0x53   : > { %905 = vmatpush.bf16.msra.mxu1 %v867_v11  ;;  %1325 = vmatpush.bf16.msra.mxu3 %v867_v11  ;;  %vm341_vm8 = vcmp.eq.s32.totalorder %v1665_v21, %v1800_v46  ;;  %vm343_vm9 = vcmp.eq.s32.totalorder %v1665_v21, %v296_v61  ;;  %vm473_vm10 = vcmp.eq.s32.totalorder %v1667_v22, %v1800_v46  ;;  %v1847_v26 = vadd.s32 48, %v1634_v1 }
  0x54   : > { %v832_v27 = vadd.f32 %v1283_v15, %v700_v13  ;;  %v834_v28 = vadd.f32 %v1285_v16, %v702_v14  ;;  %v1188_v29 = vsel %vm341_vm8, 1.0, %v1518_v25  ;;  %v1190_v30 = vsel %vm343_vm9, 1.0, %v1518_v25 }
  0x55   : > { %vm475_vm11 = vcmp.eq.s32.totalorder %v1667_v22, %v296_v61  ;;  %v1220_v31 = vsel %vm473_vm10, 1.0, %v1518_v25  ;;  %vm605_vm12 = vcmp.eq.s32.totalorder %v1669_v23, %v1800_v46  ;;  %vm607_vm13 = vcmp.eq.s32.totalorder %v1669_v23, %v296_v61 }
  0x56   : > { %v864_v32 = vpack.c.bf16 %v834_v28, %v832_v27  ;;  %v1222_v33 = vsel %vm475_vm11, 1.0, %v1518_v25  ;;  %v569_v5 = vadd.f32 %v1220_v31, %v1188_v29  ;;  %v1252_v34 = vsel %vm605_vm12, 1.0, %v1518_v25 }
  0x57   : > { %v571_v6 = vadd.f32 %v1222_v33, %v1190_v30  ;;  %v1254_v35 = vsel %vm607_vm13, 1.0, %v1518_v25  ;;  %vm737_vm14 = vcmp.eq.s32.totalorder %v1671_v24, %v1800_v46  ;;  %vm739_vm15 = vcmp.eq.s32.totalorder %v1671_v24, %v296_v61 }
  0x58   : > { %887 = vmatpush.bf16.msra.mxu0 %v864_v32  ;;  %1318 = vmatpush.bf16.msra.mxu2 %v864_v32  ;;  %v701_v36 = vadd.f32 %v1252_v34, %v569_v5  ;;  %v1284_v37 = vsel %vm737_vm14, 1.0, %v1518_v25  ;;  %v1286_v38 = vsel %vm739_vm15, 1.0, %v1518_v25  ;;  %v294_v39 = vadd.s32 56, %v1634_v1 }
  0x59   : > { %v703_v40 = vadd.f32 %v1254_v35, %v571_v6  ;;  %vm336_vm0 = vcmp.eq.s32.totalorder %v1657_v17, %v1847_v26  ;;  %vm468_vm1 = vcmp.eq.s32.totalorder %v1659_v18, %v1847_v26  ;;  %vm600_vm2 = vcmp.eq.s32.totalorder %v1661_v19, %v1847_v26  ;;  %v1932_v6 = vld [vmem:[%s2125_s3 + $0x10] sm:$0xff]  ;;  %v1937_v35 = vld [vmem:[%s2125_s3] sm:$0xff] }
  0x5a   : > { %v833_v41 = vadd.f32 %v1284_v37, %v701_v36  ;;  %vm338_vm3 = vcmp.eq.s32.totalorder %v1657_v17, %v294_v39  ;;  %v1183_v42 = vsel %vm336_vm0, 1.0, %v1518_v25  ;;  %vm470_vm4 = vcmp.eq.s32.totalorder %v1659_v18, %v294_v39 }
  0x5b   : > { %v835_v43 = vadd.f32 %v1286_v38, %v703_v40  ;;  %v1185_v44 = vsel %vm338_vm3, 1.0, %v1518_v25  ;;  %v1215_v45 = vsel %vm468_vm1, 1.0, %v1518_v25  ;;  %v1217_v46 = vsel %vm470_vm4, 1.0, %v1518_v25 }
  0x5c   : > { %v564_v47 = vadd.f32 %v1215_v45, %v1183_v42  ;;  %v566_v48 = vadd.f32 %v1217_v46, %v1185_v44  ;;  %vm602_vm5 = vcmp.eq.s32.totalorder %v1661_v19, %v294_v39  ;;  %v1247_v49 = vsel %vm600_vm2, 1.0, %v1518_v25 }
  0x5d   : > { %v865_v50 = vpack.c.bf16 %v835_v43, %v833_v41  ;;  %v1249_v51 = vsel %vm602_vm5, 1.0, %v1518_v25  ;;  %vm732_vm6 = vcmp.eq.s32.totalorder %v1663_v20, %v1847_v26  ;;  %vm734_vm7 = vcmp.eq.s32.totalorder %v1663_v20, %v294_v39 }
  0x5e   : > { %v696_v52 = vadd.f32 %v1247_v49, %v564_v47  ;;  %v698_v53 = vadd.f32 %v1249_v51, %v566_v48  ;;  %v1279_v54 = vsel %vm732_vm6, 1.0, %v1518_v25  ;;  %v1281_v55 = vsel %vm734_vm7, 1.0, %v1518_v25 }
  0x5f   : > { %906 = vmatpush.bf16.msra.mxu1 %v865_v50  ;;  %1326 = vmatpush.bf16.msra.mxu3 %v865_v50  ;;  %vm337_vm8 = vcmp.eq.s32.totalorder %v1665_v21, %v1847_v26  ;;  %vm339_vm9 = vcmp.eq.s32.totalorder %v1665_v21, %v294_v39  ;;  %vm469_vm10 = vcmp.eq.s32.totalorder %v1667_v22, %v1847_v26  ;;  %v1891_v56 = vadd.s32 32, %v1634_v1 }
  0x60   : > { %v828_v57 = vadd.f32 %v1279_v54, %v696_v52  ;;  %v830_v58 = vadd.f32 %v1281_v55, %v698_v53  ;;  %v1184_v59 = vsel %vm337_vm8, 1.0, %v1518_v25  ;;  %v1186_v60 = vsel %vm339_vm9, 1.0, %v1518_v25 }
  0x61   : > { %vm471_vm11 = vcmp.eq.s32.totalorder %v1667_v22, %v294_v39  ;;  %v1216_v61 = vsel %vm469_vm10, 1.0, %v1518_v25  ;;  %vm601_vm12 = vcmp.eq.s32.totalorder %v1669_v23, %v1847_v26  ;;  %vm603_vm13 = vcmp.eq.s32.totalorder %v1669_v23, %v294_v39 }
  0x62   : > { %v862_v62 = vpack.c.bf16 %v830_v58, %v828_v57  ;;  %v1218_v7 = vsel %vm471_vm11, 1.0, %v1518_v25  ;;  %v565_v8 = vadd.f32 %v1216_v61, %v1184_v59  ;;  %v1248_v63 = vsel %vm601_vm12, 1.0, %v1518_v25  ;;  %v1979_v57 = vld [vmem:[%s2125_s3 + $0x8] sm:$0xff] }
  0x63   : > { %v567_v0 = vadd.f32 %v1218_v7, %v1186_v60  ;;  %v1250_v2 = vsel %vm603_vm13, 1.0, %v1518_v25  ;;  %vm733_vm14 = vcmp.eq.s32.totalorder %v1671_v24, %v1847_v26  ;;  %vm735_vm15 = vcmp.eq.s32.totalorder %v1671_v24, %v294_v39 }
  0x64   : > { %888 = vmatpush.bf16.msra.mxu0 %v862_v62  ;;  %1319 = vmatpush.bf16.msra.mxu2 %v862_v62  ;;  %v697_v3 = vadd.f32 %v1248_v63, %v565_v8  ;;  %v1280_v4 = vsel %vm733_vm14, 1.0, %v1518_v25  ;;  %v1282_v9 = vsel %vm735_vm15, 1.0, %v1518_v25  ;;  %v292_v10 = vadd.s32 40, %v1634_v1 }
  0x65   : > { %v699_v11 = vadd.f32 %v1250_v2, %v567_v0  ;;  %vm332_vm0 = vcmp.eq.s32.totalorder %v1657_v17, %v1891_v56  ;;  %vm464_vm1 = vcmp.eq.s32.totalorder %v1659_v18, %v1891_v56  ;;  %vm596_vm2 = vcmp.eq.s32.totalorder %v1661_v19, %v1891_v56 }
  0x66   : > { %v829_v12 = vadd.f32 %v1280_v4, %v697_v3  ;;  %vm334_vm3 = vcmp.eq.s32.totalorder %v1657_v17, %v292_v10  ;;  %v1179_v13 = vsel %vm332_vm0, 1.0, %v1518_v25  ;;  %vm466_vm4 = vcmp.eq.s32.totalorder %v1659_v18, %v292_v10 }
  0x67   : > { %v831_v14 = vadd.f32 %v1282_v9, %v699_v11  ;;  %v1181_v15 = vsel %vm334_vm3, 1.0, %v1518_v25  ;;  %v1211_v16 = vsel %vm464_vm1, 1.0, %v1518_v25  ;;  %v1213_v26 = vsel %vm466_vm4, 1.0, %v1518_v25 }
  0x68   : > { %v560_v27 = vadd.f32 %v1211_v16, %v1179_v13  ;;  %v562_v28 = vadd.f32 %v1213_v26, %v1181_v15  ;;  %vm598_vm5 = vcmp.eq.s32.totalorder %v1661_v19, %v292_v10  ;;  %v1243_v29 = vsel %vm596_vm2, 1.0, %v1518_v25 }
  0x69   : > { %v863_v30 = vpack.c.bf16 %v831_v14, %v829_v12  ;;  %v1245_v31 = vsel %vm598_vm5, 1.0, %v1518_v25  ;;  %vm728_vm6 = vcmp.eq.s32.totalorder %v1663_v20, %v1891_v56  ;;  %vm730_vm7 = vcmp.eq.s32.totalorder %v1663_v20, %v292_v10 }
  0x6a   : > { %v692_v32 = vadd.f32 %v1243_v29, %v560_v27  ;;  %v694_v33 = vadd.f32 %v1245_v31, %v562_v28  ;;  %v1275_v5 = vsel %vm728_vm6, 1.0, %v1518_v25  ;;  %v1277_v34 = vsel %vm730_vm7, 1.0, %v1518_v25 }
  0x6b   : > { %907 = vmatpush.bf16.msra.mxu1 %v863_v30  ;;  %1327 = vmatpush.bf16.msra.mxu3 %v863_v30  ;;  %vm333_vm8 = vcmp.eq.s32.totalorder %v1665_v21, %v1891_v56  ;;  %vm335_vm9 = vcmp.eq.s32.totalorder %v1665_v21, %v292_v10  ;;  %vm465_vm10 = vcmp.eq.s32.totalorder %v1667_v22, %v1891_v56  ;;  %v1519_v40 = vmov 0  }
  0x6c   : > { %v824_v36 = vadd.f32 %v1275_v5, %v692_v32  ;;  %v826_v37 = vadd.f32 %v1277_v34, %v694_v33  ;;  %v1180_v38 = vsel %vm333_vm8, 1.0, %v1518_v25  ;;  %v1182_v39 = vsel %vm335_vm9, 1.0, %v1518_v25  ;;  %1400 = vset.pattern.permute.xlu1 %v1519_v40  ;;  %1399 = vset.pattern.permute.xlu0 %v1519_v40 }
  0x6d   : > { %vm467_vm11 = vcmp.eq.s32.totalorder %v1667_v22, %v292_v10  ;;  %v1212_v41 = vsel %vm465_vm10, 1.0, %v1518_v25  ;;  %vm597_vm12 = vcmp.eq.s32.totalorder %v1669_v23, %v1891_v56  ;;  %vm599_vm13 = vcmp.eq.s32.totalorder %v1669_v23, %v292_v10  ;;  %958 = vperm.xlu1 %1400, %v1932_v6   ;;  %948 = vperm.xlu0 %1399, %v1937_v35  }
  0x6e   : > { %v860_v42 = vpack.c.bf16 %v826_v37, %v824_v36  ;;  %v1214_v43 = vsel %vm467_vm11, 1.0, %v1518_v25  ;;  %v561_v44 = vadd.f32 %v1212_v41, %v1180_v38  ;;  %v1244_v45 = vsel %vm597_vm12, 1.0, %v1518_v25 }
  0x6f   : > { %v563_v46 = vadd.f32 %v1214_v43, %v1182_v39  ;;  %v1246_v47 = vsel %vm599_vm13, 1.0, %v1518_v25  ;;  %vm729_vm14 = vcmp.eq.s32.totalorder %v1671_v24, %v1891_v56  ;;  %vm731_vm15 = vcmp.eq.s32.totalorder %v1671_v24, %v292_v10  ;;  %v1974_v56 = vld [vmem:[%s2125_s3 + $0x18] sm:$0xff] }
  0x70   : > { %889 = vmatpush.bf16.msra.mxu0 %v860_v42  ;;  %1320 = vmatpush.bf16.msra.mxu2 %v860_v42  ;;  %v693_v48 = vadd.f32 %v1244_v45, %v561_v44  ;;  %v1276_v49 = vsel %vm729_vm14, 1.0, %v1518_v25  ;;  %v1278_v50 = vsel %vm731_vm15, 1.0, %v1518_v25  ;;  %v289_v51 = vadd.s32 16, %v1634_v1 }
  0x71   : > { %v695_v52 = vadd.f32 %v1246_v47, %v563_v46  ;;  %v290_v53 = vadd.s32 24, %v1634_v1  ;;  %v1964_v54 = vadd.s32 8, %v1634_v1  ;;  %vm324_vm3 = vcmp.eq.s32.totalorder %v1657_v17, %v1634_v1 }
  0x72   : > { %v825_v55 = vadd.f32 %v1276_v49, %v693_v48  ;;  %vm328_vm0 = vcmp.eq.s32.totalorder %v1657_v17, %v289_v51  ;;  %vm460_vm1 = vcmp.eq.s32.totalorder %v1659_v18, %v289_v51  ;;  %vm592_vm2 = vcmp.eq.s32.totalorder %v1661_v19, %v289_v51 }
  0x73   : > { %v827_v58 = vadd.f32 %v1278_v50, %v695_v52  ;;  %vm330_vm4 = vcmp.eq.s32.totalorder %v1657_v17, %v290_v53  ;;  %v1175_v59 = vsel %vm328_vm0, 1.0, %v1518_v25  ;;  %vm462_vm5 = vcmp.eq.s32.totalorder %v1659_v18, %v290_v53 }
  0x74   : > { %v1177_v60 = vsel %vm330_vm4, 1.0, %v1518_v25  ;;  %v1207_v61 = vsel %vm460_vm1, 1.0, %v1518_v25  ;;  %v1209_v62 = vsel %vm462_vm5, 1.0, %v1518_v25  ;;  %vm594_vm6 = vcmp.eq.s32.totalorder %v1661_v19, %v290_v53 }
  0x75   : > { %v861_v7 = vpack.c.bf16 %v827_v58, %v825_v55  ;;  %v556_v8 = vadd.f32 %v1207_v61, %v1175_v59  ;;  %v558_v63 = vadd.f32 %v1209_v62, %v1177_v60  ;;  %v1239_v0 = vsel %vm592_vm2, 1.0, %v1518_v25  ;;  %963 = vperm.xlu1 %1400, %v1974_v56   ;;  %953 = vperm.xlu0 %1399, %v1979_v57   ;;  %v945_v62 = vld [vmem:[%s1627_s26] sm:$0x3]  ;;  %s1314_s26 = sshll.u32 %s1508_s18, 4 }
  0x76   : > { %v1241_v2 = vsel %vm594_vm6, 1.0, %v1518_v25  ;;  %vm724_vm7 = vcmp.eq.s32.totalorder %v1663_v20, %v289_v51  ;;  %vm726_vm8 = vcmp.eq.s32.totalorder %v1663_v20, %v290_v53  ;;  %vm329_vm9 = vcmp.eq.s32.totalorder %v1665_v21, %v289_v51  ;;  %s1047_s10 = scalar_lea.hbm %s2126_s4, %s1314_s26 }
  0x77   : > { %908 = vmatpush.bf16.msra.mxu1 %v861_v7  ;;  %1328 = vmatpush.bf16.msra.mxu3 %v861_v7  ;;  %v688_v3 = vadd.f32 %v1239_v0, %v556_v8  ;;  %v690_v4 = vadd.f32 %v1241_v2, %v558_v63  ;;  %v1271_v9 = vsel %vm724_vm7, 1.0, %v1518_v25  ;;  %v1273_v10 = vsel %vm726_vm8, 1.0, %v1518_v25  ;;  %s1050_s18 = sshll.u32 %s1047_s10, 4  ;;  %s1051_s18 = int_to_ptr.hbm [resolvable:$true] %s1050_s18 }
  0x78   : > { %vm331_vm10 = vcmp.eq.s32.totalorder %v1665_v21, %v290_v53  ;;  %v1176_v11 = vsel %vm329_vm9, 1.0, %v1518_v25  ;;  %vm461_vm11 = vcmp.eq.s32.totalorder %v1667_v22, %v289_v51  ;;  %vm463_vm12 = vcmp.eq.s32.totalorder %v1667_v22, %v290_v53  ;;  %s1448_s13 = sshra.s32 %s1051_s18, 4  ;;  %s1449_s13 = int_to_ptr.hbm [resolvable:$true] %s1448_s13 }
  0x79   : > { %v820_v12 = vadd.f32 %v1271_v9, %v688_v3  ;;  %v822_v13 = vadd.f32 %v1273_v10, %v690_v4  ;;  %v1178_v14 = vsel %vm331_vm10, 1.0, %v1518_v25  ;;  %v1208_v15 = vsel %vm461_vm11, 1.0, %v1518_v25  ;;  %s1450_s14 = scalar_lea.hbm %s1449_s13, 64  ;;  %p1455_p8 = scmp.lt.s32.totalorder %s1449_s13, %s2126_s4 }
  0x7a   : > { %v1210_v16 = vsel %vm463_vm12, 1.0, %v1518_v25  ;;  %v557_v26 = vadd.f32 %v1208_v15, %v1176_v11  ;;  %vm593_vm13 = vcmp.eq.s32.totalorder %v1669_v23, %v289_v51  ;;  %vm595_vm14 = vcmp.eq.s32.totalorder %v1669_v23, %v290_v53  ;;  %p1451_p5 = scmp.ne.s32.totalorder %s1449_s13, %s1450_s14  ;;  %p1456_p10 = scmp.lt.s32.totalorder %s1454_s25, %s1450_s14 }
  0x7b   : > { %v858_v27 = vpack.c.bf16 %v822_v13, %v820_v12  ;;  %v559_v28 = vadd.f32 %v1210_v16, %v1178_v14  ;;  %v1240_v29 = vsel %vm593_vm13, 1.0, %v1518_v25  ;;  %v1242_v30 = vsel %vm595_vm14, 1.0, %v1518_v25 }
  0x7c   : > { %v689_v31 = vadd.f32 %v1240_v29, %v557_v26  ;;  %vm725_vm15 = vcmp.eq.s32.totalorder %v1671_v24, %v289_v51  ;;  %vm727_vm0 = vcmp.eq.s32.totalorder %v1671_v24, %v290_v53  ;;  %vm326_vm1 = vcmp.eq.s32.totalorder %v1657_v17, %v1964_v54  ;;  %p1452_p6 = pnand %p1451_p5, %p1600_p9  ;;  %p1457_p13 = por %p1456_p10, %p1455_p8 }
  0x7d   : > { %890 = vmatpush.bf16.msra.mxu0 %v858_v27  ;;  %1321 = vmatpush.bf16.msra.mxu2 %v858_v27  ;;  %v691_v32 = vadd.f32 %v1242_v30, %v559_v28  ;;  %v1272_v33 = vsel %vm725_vm15, 1.0, %v1518_v25  ;;  %v1274_v5 = vsel %vm727_vm0, 1.0, %v1518_v25  ;;  %v1171_v34 = vsel %vm324_vm3, 1.0, %v1518_v25 }
  0x7e   : > { %v821_v36 = vadd.f32 %v1272_v33, %v689_v31  ;;  %v1173_v37 = vsel %vm326_vm1, 1.0, %v1518_v25  ;;  %vm456_vm2 = vcmp.eq.s32.totalorder %v1659_v18, %v1634_v1  ;;  %vm458_vm4 = vcmp.eq.s32.totalorder %v1659_v18, %v1964_v54  ;;  %p1453_p7 = pneg %p1452_p6 }
  0x7f   : > { %v823_v38 = vadd.f32 %v1274_v5, %v691_v32  ;;  %v1203_v39 = vsel %vm456_vm2, 1.0, %v1518_v25  ;;  %v1205_v40 = vsel %vm458_vm4, 1.0, %v1518_v25  ;;  %vm588_vm5 = vcmp.eq.s32.totalorder %v1661_v19, %v1634_v1 }
  0x80   : > { %v552_v41 = vadd.f32 %v1203_v39, %v1171_v34  ;;  %v554_v17 = vadd.f32 %v1205_v40, %v1173_v37  ;;  %vm590_vm3 = vcmp.eq.s32.totalorder %v1661_v19, %v1964_v54  ;;  %v1235_v42 = vsel %vm588_vm5, 1.0, %v1518_v25  ;;  %p1458_p0 = pnand %p1457_p13, %p1453_p7 }
  0x81   : > { %v859_v43 = vpack.c.bf16 %v823_v38, %v821_v36  ;;  %v1237_v44 = vsel %vm590_vm3, 1.0, %v1518_v25  ;;  %vm720_vm6 = vcmp.eq.s32.totalorder %v1663_v20, %v1634_v1  ;;  %vm722_vm7 = vcmp.eq.s32.totalorder %v1663_v20, %v1964_v54 }
  0x82   : > { %v684_v18 = vadd.f32 %v1235_v42, %v552_v41  ;;  %v686_v45 = vadd.f32 %v1237_v44, %v554_v17  ;;  %v1267_v46 = vsel %vm720_vm6, 1.0, %v1518_v25  ;;  %v1269_v47 = vsel %vm722_vm7, 1.0, %v1518_v25 }
  0x83   : > { %909 = vmatpush.bf16.msra.mxu1 %v859_v43  ;;  %1329 = vmatpush.bf16.msra.mxu3 %v859_v43  ;;  %vm325_vm8 = vcmp.eq.s32.totalorder %v1665_v21, %v1634_v1  ;;  %vm327_vm9 = vcmp.eq.s32.totalorder %v1665_v21, %v1964_v54  ;;  %vm457_vm10 = vcmp.eq.s32.totalorder %v1667_v22, %v1634_v1  ;;  %v1520_v50 = vmov 1  }
  0x84   : > { %v816_v19 = vadd.f32 %v1267_v46, %v684_v18  ;;  %v818_v48 = vadd.f32 %v1269_v47, %v686_v45  ;;  %v1172_v20 = vsel %vm325_vm8, 1.0, %v1518_v25  ;;  %v1174_v49 = vsel %vm327_vm9, 1.0, %v1518_v25  ;;  %1403 = vset.pattern.permute.xlu1 %v1520_v50  ;;  %1402 = vset.pattern.permute.xlu0 %v1520_v50 }
  0x85   : > { %vm459_vm11 = vcmp.eq.s32.totalorder %v1667_v22, %v1964_v54  ;;  %v1204_v51 = vsel %vm457_vm10, 1.0, %v1518_v25  ;;  %vm589_vm12 = vcmp.eq.s32.totalorder %v1669_v23, %v1634_v1  ;;  %vm591_vm13 = vcmp.eq.s32.totalorder %v1669_v23, %v1964_v54  ;;  %992 = vperm.xlu1 %1403, %v1974_v56   ;;  %988 = vperm.xlu0 %1402, %v1932_v6   ;;  %v1312_v23 = vld [vmem:[%s2124_s2] sm:$0xff]  ;;  %v1313_v6 = vld [vmem:[%s2124_s2 + $0x8] sm:$0xff] }
  0x86   : > { %v856_v21 = vpack.c.bf16 %v818_v48, %v816_v19  ;;  %v1206_v52 = vsel %vm459_vm11, 1.0, %v1518_v25  ;;  %v553_v53 = vadd.f32 %v1204_v51, %v1172_v20  ;;  %v1236_v55 = vsel %vm589_vm12, 1.0, %v1518_v25  ;;  %1401 = vset.pattern.permute.xlu2 %v1520_v50 }
  0x87   : > { %v555_v22 = vadd.f32 %v1206_v52, %v1174_v49  ;;  %v1238_v58 = vsel %vm591_vm13, 1.0, %v1518_v25  ;;  %vm721_vm14 = vcmp.eq.s32.totalorder %v1671_v24, %v1634_v1  ;;  %vm723_vm15 = vcmp.eq.s32.totalorder %v1671_v24, %v1964_v54  ;;  %980 = vperm.xlu2 %1401, %v1937_v35  }
  0x88   : > { %891 = vmatpush.bf16.msra.mxu0 %v856_v21  ;;  %1322 = vmatpush.bf16.msra.mxu2 %v856_v21  ;;  %v685_v56 = vadd.f32 %v1236_v55, %v553_v53  ;;  %v1268_v59 = vsel %vm721_vm14, 1.0, %v1518_v25  ;;  %v1270_v1 = vsel %vm723_vm15, 1.0, %v1518_v25  ;;  %v967_v7 = vperm.slane %v945_v62, 0 }
  0x89   : > { %v687_v60 = vadd.f32 %v1238_v58, %v555_v22  ;;  %v968_v2 = vperm.slane %v945_v62, 1 }
  0x8a   : > { %v817_v24 = vadd.f32 %v1268_v59, %v685_v56 }
  0x8b   : > { %v819_v54 = vadd.f32 %v1270_v1, %v687_v60  ;;  %892 = vmatmul.bf16.vlgmr.msra.gmra.mxu0 %v1312_v23  ;;  %897 = vmatmul.bf16.vlgmr.msra.gmra.mxu2 %v1313_v6 }
  0x8d   : > { %v857_v61 = vpack.c.bf16 %v819_v54, %v817_v24 }
  0x8f   : > { %910 = vmatpush.bf16.msra.mxu1 %v857_v61  ;;  %1330 = vmatpush.bf16.msra.mxu3 %v857_v61 }
  0x90   : > { %984 = vperm.xlu2 %1401, %v1979_v57  }
  0x92   : > { %911 = vmatmul.bf16.vlgmr.msra.gmra.mxu1 %v1312_v23  ;;  %916 = vmatmul.bf16.vlgmr.msra.gmra.mxu3 %v1313_v6 }
  0xdf   : > { %v949_v35 = vpop.permute.xlu0 %948  ;;  %v959_v8 = vpop.permute.xlu1 %958 }
  0xe0   : > { %v971_v0 = vmul.f32 %v967_v7, %v949_v35  ;;  %v972_v10 = vmul.f32 %v968_v2, %v949_v35  ;;  %v975_v12 = vmul.f32 %v967_v7, %v959_v8  ;;  %v976_v34 = vmul.f32 %v968_v2, %v959_v8 }
  0xe1   : > { %v981_v25 = vpop.permute.xlu2 %980 }
  0xe2   : > { %v995_v3 = vadd.f32 %v981_v25, %v971_v0  ;;  %v996_v15 = vadd.f32 %v981_v25, %v972_v10 }
  0xe7   : > { %v954_v63 = vpop.permute.xlu0 %953  ;;  %v964_v11 = vpop.permute.xlu1 %963 }
  0xe8   : > { %v973_v57 = vmul.f32 %v967_v7, %v954_v63  ;;  %v977_v37 = vmul.f32 %v967_v7, %v964_v11  ;;  %v974_v39 = vmul.f32 %v968_v2, %v954_v63  ;;  %v978_v20 = vmul.f32 %v968_v2, %v964_v11 }
  0xea   : > { %v985_v16 = vpop.permute.xlu2 %984 }
  0xeb   : > { %v997_v32 = vadd.f32 %v985_v16, %v973_v57  ;;  %v998_v46 = vadd.f32 %v985_v16, %v974_v39 }
  0xf7   : > { %v989_v14 = vpop.permute.xlu0 %988  ;;  %v993_v40 = vpop.permute.xlu1 %992 }
  0xf8   : > { %v999_v27 = vadd.f32 %v989_v14, %v975_v12  ;;  %v1000_v17 = vadd.f32 %v989_v14, %v976_v34  ;;  %v1001_v44 = vadd.f32 %v993_v40, %v977_v37  ;;  %v1002_v51 = vadd.f32 %v993_v40, %v978_v20 }
 0x108   : > { %v893_v4 = vpop.f32.mrf.mxu0 }
 0x109   : > { %v1011_v9 = vmul.f32 0.25, %v893_v4 }
 0x10b   : > { %v1019_v13 = vadd.f32 %v1011_v9, %v995_v3 }
 0x10d   : > { %1027 = vst [vmem:[%s2073_s8] sm:$0xff] %v1019_v13 }
 0x10e   : > { %v898_v26 = vpop.f32.mrf.mxu2 }
 0x10f   : > { %v912_v28 = vpop.f32.mrf.mxu1  ;;  %v1015_v29 = vmul.f32 0.25, %v898_v26 }
 0x110   : > { %v1012_v30 = vmul.f32 0.25, %v912_v28  ;;  %v895_v31 = vpop.f32.mrf.mxu0 }
 0x111   : > { %v1023_v33 = vadd.f32 %v1015_v29, %v999_v27  ;;  %v1013_v5 = vmul.f32 0.25, %v895_v31 }
 0x112   : > { %v1020_v36 = vadd.f32 %v1012_v30, %v996_v15 }
 0x113   : > { %1031 = vst [vmem:[%s2073_s8 + $0x20] sm:$0xff] %v1023_v33  ;;  %v1021_v38 = vadd.f32 %v1013_v5, %v997_v32 }
 0x114   : > { %1028 = vst [vmem:[%s2073_s8 + $0x8] sm:$0xff] %v1020_v36 }
 0x115   : > { %v917_v41 = vpop.f32.mrf.mxu3  ;;  %1029 = vst [vmem:[%s2073_s8 + $0x10] sm:$0xff] %v1021_v38 }
 0x116   : > { %v1016_v42 = vmul.f32 0.25, %v917_v41  ;;  %v900_v43 = vpop.f32.mrf.mxu2 }
 0x117   : > { %v914_v18 = vpop.f32.mrf.mxu1  ;;  %v1017_v45 = vmul.f32 0.25, %v900_v43 }
 0x118   : > { %v1024_v47 = vadd.f32 %v1016_v42, %v1000_v17  ;;  %v1014_v19 = vmul.f32 0.25, %v914_v18 }
 0x119   : > { %v1025_v48 = vadd.f32 %v1017_v45, %v1001_v44 }
 0x11a   : > { %1032 = vst [vmem:[%s2073_s8 + $0x28] sm:$0xff] %v1024_v47  ;;  %v1022_v49 = vadd.f32 %v1014_v19, %v998_v46 }
 0x11b   : > { %1033 = vst [vmem:[%s2073_s8 + $0x30] sm:$0xff] %v1025_v48 }
 0x11c   : > { %1030 = vst [vmem:[%s2073_s8 + $0x18] sm:$0xff] %v1022_v49 }
 0x11d   : > { %v919_v50 = vpop.f32.mrf.mxu3 }
 0x11e   : > { %v1018_v21 = vmul.f32 0.25, %v919_v50 }
 0x120   : > { %v1026_v52 = vadd.f32 %v1018_v21, %v1002_v51 }
 0x122   : > { %1034 = vst [vmem:[%s2073_s8 + $0x38] sm:$0xff] %v1026_v52 }
 0x123   : > { %1461 = shalt.err (!%p1458_p0)
}
 0x124   : > { %s1521_s21 = smov 256   ;;  %s1522_s7 = smov 512  }
 0x125   : > { %s1523_s8 = smov 16  }
 0x126   : > { %1333 = dma.vmem_to_hbm [thread:$0]  (%p1600_p9), %s1049_s11, 1024, %s1051_s18, %s1036_s12, %s1521_s21, %s1522_s7, %s1523_s8  }
 0x127 PF: > { %s1065_s26 = sand.u32 1, %s1496_s15   ;;  %p1340_p1 = pnand %p1163_p12, %p1607_p11 }
 0x128   : > { %s1066_s27 = scalar_lea.sflag [#allocation5], %s1065_s26 }
 0x129   : > { %p1341_p2 = pneg %p1340_p1 }
 0x12b   : > { %1491 = dma.done.wait (%p1341_p2), %s1066_s27, 1024  }
 0x12c   : > { %1493 = vsyncadd (%p1341_p2), %s1066_s27, 4294966272  ;;  %s20_s20 = sadd.s32 1, %s1516_s20   ;;  %s2131_s15 = smov %s1500_s16 }
 0x12d   : > { %p17_p3 = scmp.ge.s32.totalorder %s20_s20, 4   ;;  %s2132_s16 = smov %s1504_s17 }
 0x12e   : > { %s2133_s17 = smov %s1605_s29  ;;  %s2134_s18 = smov %s1512_s19 }
 0x12f   : > { %s2135_s19 = smov %s2137_s23  ;;  %19 = sbr.rel (!%p17_p3) target bundleno = 6 (0x6), region = 95 }
 0x134   :  { %1072 = vsyncpa [#allocation4], 1 }
 0x135   :  { %1074 = vsyncpa [#allocation4 + $0x1], 1 }
 0x136   :  { %1075 = vsyncpa [#allocation5], 1 }
 0x137   :  { %1077 = vsyncpa [#allocation5 + $0x1], 1 }

</bundles_post_ra>
